<compile_context>
chip_gen: v7x
topology: tpu7x:2x2x1
jax: 0.10.0
libtpu: 0.0.40
codegen_flags: <defaults>
</compile_context>

<pallas_src>
import math
import functools

import jax
import jax.numpy as jnp
from jax.experimental import pallas as pl
from jax.experimental.pallas import tpu as pltpu


# ----------------------------- Pallas kernels ------------------------------ #
def pe_add_dropout_kernel(x_ref, pe_ref, u_ref, o_ref, *, keep_prob):
    # x_ref: (tS, B, D), pe_ref: (tS, 1, D) (broadcast over B), u_ref: (tS, B, D) f32.
    y = x_ref[...] + pe_ref[...]                       # promoted dtype of (x, pe)
    keep = u_ref[...] < jnp.float32(keep_prob)         # P(keep) == keep_prob exactly
    scale = jnp.asarray(1.0 / keep_prob, dtype=y.dtype)
    y = jnp.where(keep, y * scale, jnp.zeros_like(y))  # inverted dropout
    o_ref[...] = y.astype(o_ref.dtype)


def pe_add_kernel(x_ref, pe_ref, o_ref):
    # Eval mode: dropout is identity.
    o_ref[...] = (x_ref[...] + pe_ref[...]).astype(o_ref.dtype)


# ------------------------------ JAX wrapper -------------------------------- #
def make_positional_encoding(d_model, max_len=5000, dtype=jnp.float32):
    """Deterministically build the pe buffer exactly like the PyTorch __init__."""
    position = jnp.arange(0, max_len, dtype=jnp.float32)[:, None]            # (L, 1)
    div_term = jnp.exp(
        jnp.arange(0, d_model, 2, dtype=jnp.float32) * (-math.log(10000.0) / d_model)
    )                                                                         # (D/2,)
    pe = jnp.zeros((max_len, d_model), dtype=jnp.float32)
    pe = pe.at[:, 0::2].set(jnp.sin(position * div_term))
    pe = pe.at[:, 1::2].set(jnp.cos(position * div_term))
    # pe.unsqueeze(0).transpose(0, 1) -> (max_len, 1, d_model)
    return pe[:, None, :].astype(dtype)


def _choose_block_s(S, B, D, itemsize, budget_bytes=2 * 1024 * 1024):
    """Rows per tile so one x tile is ~budget_bytes; keeps 2x(x+u+out+pe)
    double-buffered well under the smallest scoped-VMEM default across
    v5e/v6e/v7x while staying big enough to amortize per-step overhead."""
    row_bytes = max(1, B * D * itemsize)
    return int(max(1, min(S, budget_bytes // row_bytes)))


def positional_encoding_forward(x, pe, *, key=None, p=0.5, training=True,
                                block_s=None):
    """x: (S, B, D). pe: (max_len, 1, D). Returns dropout(x + pe[:S])."""
    S, B, D = x.shape
    apply_dropout = bool(training) and p > 0.0
    keep_prob = 1.0 - p

    if block_s is None:
        block_s = _choose_block_s(S, B, D, jnp.dtype(x.dtype).itemsize)
    grid = (pl.cdiv(S, block_s),)

    x_spec = pl.BlockSpec((block_s, B, D), lambda i: (i, 0, 0))
    pe_spec = pl.BlockSpec((block_s, 1, D), lambda i: (i, 0, 0))  # full pe, no HBM slice
    out_spec = pl.BlockSpec((block_s, B, D), lambda i: (i, 0, 0))
    compiler_params = pltpu.CompilerParams(dimension_semantics=("parallel",))

    if not apply_dropout:
        return pl.pallas_call(
            pe_add_kernel,
            out_shape=jax.ShapeDtypeStruct((S, B, D), x.dtype),
            grid=grid,
            in_specs=[x_spec, pe_spec],
            out_specs=out_spec,
            compiler_params=compiler_params,
        )(x, pe)

    if key is None:
        key = jax.random.PRNGKey(0)
    # TODO(synk): on real TPU hardware this mask could be generated in-kernel via
    # pltpu.prng_random_bits (seeded with seed + pl.program_id(0)) to avoid
    # streaming it from HBM; the hardware PRNG primitives have no CPU/interpret
    # lowering, so we keep the portable precomputed-uniform path here.
    u = jax.random.uniform(key, (S, B, D), dtype=jnp.float32)
    u_spec = pl.BlockSpec((block_s, B, D), lambda i: (i, 0, 0))

    kernel = functools.partial(pe_add_dropout_kernel, keep_prob=keep_prob)
    return pl.pallas_call(
        kernel,
        out_shape=jax.ShapeDtypeStruct((S, B, D), x.dtype),
        grid=grid,
        in_specs=[x_spec, pe_spec, u_spec],
        out_specs=out_spec,
        compiler_params=compiler_params,
    )(x, pe, u)


# --------------------------------- main ------------------------------------ #
if __name__ == "__main__":
    seq, batch, d_model = 8, 2, 32
    max_len = 64

    key = jax.random.PRNGKey(0)
    kx, kd = jax.random.split(key)
    x = jax.random.normal(kx, (seq, batch, d_model), dtype=jnp.float32)
    pe = make_positional_encoding(d_model, max_len=max_len)

    ref = x + pe[:seq]

    # Eval-mode pass (dropout is identity) — check against pure-JAX reference.
    out_eval = positional_encoding_forward(x, pe, training=False)
    out_eval = jax.block_until_ready(out_eval)
    assert out_eval.shape == (seq, batch, d_model)
    assert jnp.allclose(out_eval, ref, atol=1e-6), "eval output mismatch"

    # Training-mode pass (dropout p=0.5). The mask won't bit-match torch's RNG
    # stream, only its distributional semantics.
    out_train = positional_encoding_forward(x, pe, key=kd, p=0.5, training=True)
    out_train = jax.block_until_ready(out_train)
    assert out_train.shape == (seq, batch, d_model)
    # Kept elements are exactly 2*(x+pe); dropped elements are exactly 0.
    is_zero = out_train == 0.0
    is_scaled = jnp.isclose(out_train, 2.0 * ref, atol=1e-5, rtol=1e-5)
    assert bool(jnp.all(is_zero | is_scaled)), "dropout output not {0, 2*(x+pe)}"

    print("KERNEL_OK")
</pallas_src>

<mosaic_0001>
module attributes {stable_mosaic.version = 11 : i64} {
  func.func @pe_add_kernel(%arg0: i32, %arg1: memref<8x2x32xf32, #tpu.memory_space<vmem>>, %arg2: memref<8x1x32xf32, #tpu.memory_space<vmem>>, %arg3: memref<8x2x32xf32, #tpu.memory_space<vmem>>) attributes {dimension_semantics = [#tpu.dimension_semantics<parallel>], iteration_bounds = array<i64: 1>, scalar_prefetch = 0 : i64, scratch_operands = 0 : i64, tpu.core_type = #tpu.core_type<tc>, window_params = [{transform_indices = @transform_0, window_bounds = array<i64: 8, 2, 32>}, {transform_indices = @transform_1, window_bounds = array<i64: 8, 1, 32>}, {transform_indices = @transform_2, window_bounds = array<i64: 8, 2, 32>}]} {
    %c0 = arith.constant 0 : index
    %c0_0 = arith.constant 0 : index
    %c0_1 = arith.constant 0 : index
    %0 = vector.load %arg1[%c0, %c0_0, %c0_1] : memref<8x2x32xf32, #tpu.memory_space<vmem>>, vector<8x2x32xf32>
    %c0_2 = arith.constant 0 : index
    %c0_3 = arith.constant 0 : index
    %c0_4 = arith.constant 0 : index
    %1 = vector.load %arg2[%c0_2, %c0_3, %c0_4] : memref<8x1x32xf32, #tpu.memory_space<vmem>>, vector<8x1x32xf32>
    %2 = vector.broadcast %1 : vector<8x1x32xf32> to vector<8x2x32xf32>
    %3 = arith.addf %0, %2 : vector<8x2x32xf32>
    %c0_5 = arith.constant 0 : index
    %c0_6 = arith.constant 0 : index
    %c0_7 = arith.constant 0 : index
    %4 = vector.load %arg3[%c0_5, %c0_6, %c0_7] : memref<8x2x32xf32, #tpu.memory_space<vmem>>, vector<8x2x32xf32>
    tpu.vector_store %arg3[%c0_5, %c0_6, %c0_7], %3 {strides = array<i32>} : memref<8x2x32xf32, #tpu.memory_space<vmem>>, vector<8x2x32xf32>,
    return
  }
  func.func @transform_0(%arg0: i32) -> (i32, i32, i32) {
    %c0_i32 = arith.constant 0 : i32
    %c0_i32_0 = arith.constant 0 : i32
    %c0_i32_1 = arith.constant 0 : i32
    return %arg0, %c0_i32, %c0_i32_0 : i32, i32, i32
  }
  func.func @transform_1(%arg0: i32) -> (i32, i32, i32) {
    %c0_i32 = arith.constant 0 : i32
    %c0_i32_0 = arith.constant 0 : i32
    %c0_i32_1 = arith.constant 0 : i32
    return %arg0, %c0_i32, %c0_i32_0 : i32, i32, i32
  }
  func.func @transform_2(%arg0: i32) -> (i32, i32, i32) {
    %c0_i32 = arith.constant 0 : i32
    %c0_i32_0 = arith.constant 0 : i32
    %c0_i32_1 = arith.constant 0 : i32
    return %arg0, %c0_i32, %c0_i32_0 : i32, i32, i32
  }
}

</mosaic_0001>

<bundles_post_ra>
// kernel: tpu_custom_call.1
= control target key start
LH: loop header
LB: loop body
LE: loop exit
PB: predicated region body
PF: predicated region fallthrough
CT: control target
= control target key end

     0   :  { %vm84_vm0 = vcmask 254976   ;;  %s230_s0 = inlined_call_operand.vmem [shape: f32[8,2,32], index: 0, kind: input, shape index: {}]   ;;  %s231_s1 = inlined_call_operand.vmem [shape: f32[64,1,32], index: 1, kind: input, shape index: {}]   ;;  %s232_s2 = inlined_call_operand.hbm [shape: f32[8,2,32], index: 2, kind: output, shape index: {}]  }
   0x1   :  { %v12_v0 = vld [vmem:[%s230_s0] sm:$0x3]  ;;  %v13_v3 = vld [vmem:[%s230_s0 + $0x2] sm:$0x3]  ;;  %v14_v5 = vld [vmem:[%s230_s0 + $0x4] sm:$0x3] }
   0x2   :  { %v109_v1 = vld [vmem:[%s231_s1] ss:$0 sm:$0xff]  ;;  %v110_v4 = vld [vmem:[%s231_s1 + $0x1] ss:$0 sm:$0xff]  ;;  %v111_v7 = vld [vmem:[%s231_s1 + $0x2] ss:$0 sm:$0xff] }
   0x3   :  { %v76_v2 = vadd.f32 %v109_v1, %v12_v0  ;;  %v77_v6 = vadd.f32 %v110_v4, %v13_v3  ;;  %v15_v8 = vld [vmem:[%s230_s0 + $0x6] sm:$0x3]  ;;  %v112_v9 = vld [vmem:[%s231_s1 + $0x3] ss:$0 sm:$0xff]  ;;  %v78_v10 = vadd.f32 %v111_v7, %v14_v5  ;;  %v16_v12 = vld [vmem:[%s230_s0 + $0x8] sm:$0x3] }
   0x4   :  { %v79_v11 = vadd.f32 %v112_v9, %v15_v8  ;;  %v113_v13 = vld [vmem:[%s231_s1 + $0x4] ss:$0 sm:$0xff]  ;;  %v17_v14 = vld [vmem:[%s230_s0 + $0xa] sm:$0x3]  ;;  %v114_v16 = vld [vmem:[%s231_s1 + $0x5] ss:$0 sm:$0xff] }
   0x5   :  { %85 = vst.msk [vmem:[#allocation2] sm:$0x3] %vm84_vm0, %v76_v2  ;;  %86 = vst.msk [vmem:[#allocation2 + $0x2] sm:$0x3] %vm84_vm0, %v77_v6  ;;  %v80_v15 = vadd.f32 %v113_v13, %v16_v12  ;;  %v18_v17 = vld [vmem:[%s230_s0 + $0xc] sm:$0x3]  ;;  %v81_v19 = vadd.f32 %v114_v16, %v17_v14 }
   0x6   :  { %v115_v18 = vld [vmem:[%s231_s1 + $0x6] ss:$0 sm:$0xff]  ;;  %87 = vst.msk [vmem:[#allocation2 + $0x4] sm:$0x3] %vm84_vm0, %v78_v10  ;;  %88 = vst.msk [vmem:[#allocation2 + $0x6] sm:$0x3] %vm84_vm0, %v79_v11 }
   0x7   :  { %v82_v20 = vadd.f32 %v115_v18, %v18_v17  ;;  %v19_v21 = vld [vmem:[%s230_s0 + $0xe] sm:$0x3]  ;;  %v116_v22 = vld [vmem:[%s231_s1 + $0x7] ss:$0 sm:$0xff] }
   0x8   :  { %7 = vsyncpa [#allocation3], 0  ;;  %89 = vst.msk [vmem:[#allocation2 + $0x8] sm:$0x3] %vm84_vm0, %v80_v15  ;;  %v83_v23 = vadd.f32 %v116_v22, %v19_v21  ;;  %s144_s13 = smov [#allocation2]  }
   0x9   :  { %s98_s14 = sshll.u32 %s144_s13, 4  ;;  %90 = vst.msk [vmem:[#allocation2 + $0xa] sm:$0x3] %vm84_vm0, %v81_v19  ;;  %91 = vst.msk [vmem:[#allocation2 + $0xc] sm:$0x3] %vm84_vm0, %v82_v20  ;;  %s99_s14 = int_to_ptr.vmem [resolvable:$true] %s98_s14 }
   0xa   :  { %92 = vst.msk [vmem:[#allocation2 + $0xe] sm:$0x3] %vm84_vm0, %v83_v23  ;;  %s120_s15 = scalar_lea.vmem %s99_s14, 256  ;;  %p125_p1 = scmp.lt.s32.totalorder %s99_s14, %s99_s14 }
   0xb   :  { %p121_p0 = scmp.ne.s32.totalorder %s99_s14, %s120_s15  ;;  %p126_p2 = scmp.lt.s32.totalorder %s120_s15, %s120_s15 }
   0xd   :  { %p127_p3 = por %p126_p2, %p125_p1 }
   0xf   :  { %p128_p4 = pnand %p127_p3, %p121_p0 }
  0x11   :  { %131 = shalt.err (!%p128_p4)
}
  0x12   :  { %s132_s16 = scalar_lea.hbm %s232_s2, 256 }
  0x13   :  { %p133_p5 = scmp.ne.s32.totalorder %s232_s2, %s132_s16  ;;  %p136_p6 = scmp.lt.u32.totalorder %s132_s16, %s232_s2 }
  0x15   :  { %p138_p7 = pnand %p136_p6, %p133_p5 }
  0x17   :  { %141 = shalt.err (!%p138_p7)
}
  0x18   :  { %s145_s21 = smov 32   ;;  %s146_s22 = smov 2  }
  0x19   :  { %104 = dma.vmem_to_hbm [thread:$0]  %s99_s14, 256, %s232_s2, [#allocation3], %s145_s21, %s145_s21, %s146_s22  }
  0x1a   :  { %142 = dma.done.wait [#allocation3], 256  }
  0x1b   :  { %143 = vsyncadd [#allocation3], 4294967040 }
  0x1c   :  { %108 = vsyncpa [#allocation3], 1 }

</bundles_post_ra>
